<compile_context>
chip_gen: v7x
topology: tpu7x:2x2x1
jax: 0.10.0
libtpu: 0.0.40
codegen_flags: <defaults>
</compile_context>

<pallas_src>
import functools

import jax
import jax.numpy as jnp
from jax import lax
from jax.experimental import pallas as pl
from jax.experimental.pallas import tpu as pltpu


def _cdiv(a, b):
    return -(-a // b)


def _round_up(x, m):
    return ((x + m - 1) // m) * m


def _vmem_capacity_bytes():
    """Physical VMEM per TensorCore; conservative 64 MiB fallback (v7x)."""
    try:
        info = pltpu.get_tpu_info()
        cap = getattr(info, "vmem_capacity_bytes", None)
        if cap:
            return int(cap)
    except Exception:
        pass
    return 64 << 20


def _pick_tile_hw(C, HW, vmem_budget_bytes):
    """Spatial tile: multiple of 128, total buffered bytes within budget.

    Buffered bytes per spatial lane ~= 4 * (2*C  [double-buffered logits]
                                           + 2  [double-buffered targets]
                                           + 2  [output headroom]).
    """
    denom = 4 * (2 * C + 4)
    t = vmem_budget_bytes // max(denom, 1)
    t = max(128, min(t, 65536))
    t -= t % 128
    t = max(t, 128)
    hw128 = _round_up(HW, 128)
    return min(t, hw128)


def _focal_kernel(*args, gamma, has_alpha, needs_mask, hw, tile_hw,
                  steps_per_chunk):
    if has_alpha:
        x_ref, t_ref, a_ref, o_ref = args
    else:
        x_ref, t_ref, o_ref = args
        a_ref = None

    chunk = pl.program_id(1)
    s = pl.program_id(2)

    @pl.when(s == 0)
    def _():
        o_ref[...] = jnp.zeros_like(o_ref)

    x = x_ref[0].astype(jnp.float32)              # (C, tile_hw), classes on sublanes
    tgt = t_ref[0]                                # (1, tile_hw) int32
    C = x.shape[0]

    # log_softmax over the class (sublane) axis, per spatial lane.
    m = jnp.max(x, axis=0, keepdims=True)         # (1, tile_hw)
    sh = x - m                                    # (C, tile_hw)
    ex = jnp.exp(sh)                              # (C, tile_hw)
    sumexp = jnp.sum(ex, axis=0, keepdims=True)   # (1, tile_hw)

    # Gather the target-class logit via a boolean select (no f32 one-hot,
    # no dynamic gather on TPU).
    cls = lax.broadcasted_iota(jnp.int32, x.shape, 0)
    sel = cls == tgt                              # bool (C, tile_hw)
    xt_m = jnp.sum(jnp.where(sel, sh, 0.0), axis=0, keepdims=True)   # x_t - max

    logpt = xt_m - jnp.log(sumexp)                # (1, tile_hw)
    pt = jnp.exp(logpt)                           # (1, tile_hw) EUP op

    one_minus_pt = 1.0 - pt
    g = float(gamma)
    if g == int(g) and int(g) >= 0:               # integer gamma: multiply chain
        gi = int(g)
        if gi == 0:
            focal = jnp.ones_like(pt)
        else:
            focal = one_minus_pt
            for _ in range(gi - 1):
                focal = focal * one_minus_pt
    else:                                         # non-integer gamma: real pow
        focal = one_minus_pt ** jnp.float32(gamma)

    loss = -(focal * logpt)                       # (1, tile_hw)
    if has_alpha:
        at = jnp.sum(jnp.where(sel, a_ref[...], 0.0), axis=0, keepdims=True)
        loss = loss * at

    if needs_mask:
        # Tail tile / over-provisioned chunk steps: NaN-safe select so garbage
        # out-of-bounds reads can never leak into the accumulator.
        start = (chunk * steps_per_chunk + s) * tile_hw
        lane = lax.broadcasted_iota(jnp.int32, loss.shape, loss.ndim - 1)
        loss = jnp.where((start + lane) < hw, loss, 0.0)

    # Lane-dense partial-sum accumulation in the resident output block.
    o_ref[...] = o_ref[...] + loss[None]


def focal_loss(logits_nchw, target_nhw, *, gamma=2, alpha=None,
               size_average=True, tile_hw=None):
    """logits_nchw: (N, C, H, W) float; target_nhw: (N, H, W) int."""
    N, C, H, W = logits_nchw.shape
    HW = H * W
    M = N * HW
    assert gamma >= 0, "focal gamma must be non-negative"

    # Native NCHW consumption: free reshapes only, no transpose, NO padding.
    x = logits_nchw.reshape(N, C, HW)
    t = target_nhw.reshape(N, 1, HW).astype(jnp.int32)

    phys_vmem = _vmem_capacity_bytes()
    vmem_budget = min(phys_vmem // 2, 32 << 20)
    if tile_hw is None:
        tile_hw = _pick_tile_hw(C, HW, vmem_budget)

    total_steps = _cdiv(HW, tile_hw)
    # Small/odd batch: split spatial steps into 2 parallel chunks (v7x has 2 TCs).
    n_chunks = 2 if (N % 2 == 1 and total_steps >= 2) else 1
    steps_per_chunk = _cdiv(total_steps, n_chunks)
    needs_mask = (n_chunks * steps_per_chunk * tile_hw) != HW

    has_alpha = alpha is not None
    inputs = [x, t]
    in_specs = [
        pl.BlockSpec((1, C, tile_hw),
                     lambda n, c, s: (n, 0, c * steps_per_chunk + s)),
        pl.BlockSpec((1, 1, tile_hw),
                     lambda n, c, s: (n, 0, c * steps_per_chunk + s)),
    ]
    if has_alpha:
        if isinstance(alpha, (float, int)):
            assert C == 2, "scalar alpha implies 2 classes"
            alpha_vec = jnp.array([alpha, 1.0 - alpha], jnp.float32)
        else:
            alpha_vec = jnp.asarray(alpha, jnp.float32).reshape(-1)
        inputs.append(alpha_vec.reshape(C, 1))
        in_specs.append(pl.BlockSpec((C, 1), lambda n, c, s: (0, 0)))

    kernel = functools.partial(
        _focal_kernel, gamma=gamma, has_alpha=has_alpha, needs_mask=needs_mask,
        hw=HW, tile_hw=tile_hw, steps_per_chunk=steps_per_chunk)

    # Explicit scoped-VMEM limit derived from what the kernel actually buffers.
    est_vmem = 4 * tile_hw * (2 * C + 4) + 4 * C + (1 << 20)
    vmem_limit = int(min(phys_vmem - (2 << 20),
                         max(est_vmem + (8 << 20), 32 << 20)))
    vmem_limit = max(vmem_limit, est_vmem)

    cost = pl.CostEstimate(
        flops=int(8 * N * HW * C),
        transcendentals=int(N * HW * (C + 2)),
        bytes_accessed=int(N * C * HW * 4 + N * HW * 4
                           + N * n_chunks * tile_hw * 4),
    )

    partial_sums = pl.pallas_call(
        kernel,
        out_shape=jax.ShapeDtypeStruct((N, n_chunks, tile_hw), jnp.float32),
        grid_spec=pltpu.PrefetchScalarGridSpec(
            num_scalar_prefetch=0,
            grid=(N, n_chunks, steps_per_chunk),
            in_specs=in_specs,
            out_specs=pl.BlockSpec((1, 1, tile_hw), lambda n, c, s: (n, c, 0)),
        ),
        compiler_params=pltpu.CompilerParams(
            dimension_semantics=("parallel", "parallel", "arbitrary"),
            vmem_limit_bytes=vmem_limit),
        cost_estimate=cost,
    )(*inputs)

    total = jnp.sum(partial_sums)
    if size_average:
        return total / jnp.float32(M)
    return total


def focal_loss_ref(logits_nchw, target_nhw, *, gamma=2, alpha=None,
                   size_average=True):
    N, C, H, W = logits_nchw.shape
    x = jnp.transpose(logits_nchw, (0, 2, 3, 1)).reshape(-1, C).astype(jnp.float32)
    t = target_nhw.reshape(-1).astype(jnp.int32)
    logsm = jax.nn.log_softmax(x, axis=-1)
    logpt = jnp.take_along_axis(logsm, t[:, None], axis=1)[:, 0]
    pt = jnp.exp(logpt)
    if alpha is not None:
        if isinstance(alpha, (float, int)):
            a = jnp.array([alpha, 1.0 - alpha], jnp.float32)
        else:
            a = jnp.asarray(alpha, jnp.float32)
        logpt = logpt * a[t]
    loss = -((1.0 - pt) ** gamma) * logpt
    return loss.mean() if size_average else loss.sum()


if __name__ == "__main__":
    key = jax.random.PRNGKey(0)
    kx, kt, kx2, kt2 = jax.random.split(key, 4)

    # Test 1: no-alpha, mean, divisible spatial extent.
    N, C, H, W = 2, 4, 16, 16
    x = jax.random.normal(kx, (N, C, H, W), jnp.float32)
    t = jax.random.randint(kt, (N, H, W), 0, C, jnp.int32)
    out = jax.block_until_ready(focal_loss(x, t, gamma=2, alpha=None,
                                           size_average=True))
    ref = focal_loss_ref(x, t, gamma=2, alpha=None, size_average=True)
    assert jnp.allclose(out, ref, rtol=1e-5, atol=1e-6), (out, ref)

    # Test 2: per-class alpha, sum.
    alpha = [0.1, 0.2, 0.3, 0.4]
    out2 = jax.block_until_ready(focal_loss(x, t, gamma=2, alpha=alpha,
                                            size_average=False))
    ref2 = focal_loss_ref(x, t, gamma=2, alpha=alpha, size_average=False)
    assert jnp.allclose(out2, ref2, rtol=1e-5, atol=1e-5), (out2, ref2)

    # Test 3: odd batch + non-divisible spatial extent + forced small tile to
    # exercise the in-kernel tail mask and the 2-chunk parallel split.
    N3, C3, H3, W3 = 1, 5, 20, 20
    x3 = jax.random.normal(kx2, (N3, C3, H3, W3), jnp.float32)
    t3 = jax.random.randint(kt2, (N3, H3, W3), 0, C3, jnp.int32)
    out3 = jax.block_until_ready(focal_loss(x3, t3, gamma=2, alpha=None,
                                            size_average=True, tile_hw=128))
    ref3 = focal_loss_ref(x3, t3, gamma=2, alpha=None, size_average=True)
    assert jnp.allclose(out3, ref3, rtol=1e-5, atol=1e-6), (out3, ref3)

    print("KERNEL_OK")
</pallas_src>

<mosaic_0001>
module attributes {stable_mosaic.version = 11 : i64} {
  func.func @_focal_kernel(%arg0: i32, %arg1: i32, %arg2: i32, %arg3: memref<1x4x256xf32, #tpu.memory_space<vmem>>, %arg4: memref<1x1x256xi32, #tpu.memory_space<vmem>>, %arg5: memref<1x1x256xf32, #tpu.memory_space<vmem>>) attributes {dimension_semantics = [#tpu.dimension_semantics<parallel>, #tpu.dimension_semantics<parallel>, #tpu.dimension_semantics<arbitrary>], iteration_bounds = array<i64: 2, 1, 1>, scalar_prefetch = 0 : i64, scratch_operands = 0 : i64, tpu.core_type = #tpu.core_type<tc>, window_params = [{transform_indices = @transform_0, window_bounds = array<i64: 1, 4, 256>}, {transform_indices = @transform_1, window_bounds = array<i64: 1, 1, 256>}, {transform_indices = @transform_2, window_bounds = array<i64: 1, 1, 256>}]} {
    %c0_i32 = arith.constant 0 : i32
    %0 = arith.cmpi eq, %arg2, %c0_i32 : i32
    %1 = arith.extui %0 : i1 to i32
    %c0_i32_0 = arith.constant 0 : i32
    %2 = arith.cmpi ne, %1, %c0_i32_0 : i32
    scf.if %2 {
      %cst_17 = arith.constant 0.000000e+00 : f32
      %34 = vector.broadcast %cst_17 : f32 to vector<1x1x256xf32>
      %c0_18 = arith.constant 0 : index
      %c0_19 = arith.constant 0 : index
      %c0_20 = arith.constant 0 : index
      %35 = vector.load %arg5[%c0_18, %c0_19, %c0_20] : memref<1x1x256xf32, #tpu.memory_space<vmem>>, vector<1x1x256xf32>
      tpu.vector_store %arg5[%c0_18, %c0_19, %c0_20], %34 {strides = array<i32>} : memref<1x1x256xf32, #tpu.memory_space<vmem>>, vector<1x1x256xf32>,
    } else {
    }
    %c0 = arith.constant 0 : index
    %c0_1 = arith.constant 0 : index
    %c0_2 = arith.constant 0 : index
    %3 = vector.load %arg3[%c0, %c0_1, %c0_2] : memref<1x4x256xf32, #tpu.memory_space<vmem>>, vector<1x4x256xf32>
    %4 = vector.shape_cast %3 : vector<1x4x256xf32> to vector<4x256xf32>
    %c0_3 = arith.constant 0 : index
    %c0_4 = arith.constant 0 : index
    %c0_5 = arith.constant 0 : index
    %5 = vector.load %arg4[%c0_3, %c0_4, %c0_5] : memref<1x1x256xi32, #tpu.memory_space<vmem>>, vector<1x1x256xi32>
    %6 = vector.shape_cast %5 : vector<1x1x256xi32> to vector<1x256xi32>
    %cst = arith.constant dense<0xFF800000> : vector<256xf32>
    %7 = vector.multi_reduction <maximumf>, %4, %cst [0] : vector<4x256xf32> to vector<256xf32>
    %8 = vector.shape_cast %7 : vector<256xf32> to vector<1x256xf32>
    %9 = vector.broadcast %8 : vector<1x256xf32> to vector<4x256xf32>
    %10 = arith.subf %4, %9 : vector<4x256xf32>
    %11 = math.exp %10 : vector<4x256xf32>
    %cst_6 = arith.constant dense<0.000000e+00> : vector<256xf32>
    %12 = vector.multi_reduction <add>, %11, %cst_6 [0] : vector<4x256xf32> to vector<256xf32>
    %13 = vector.shape_cast %12 : vector<256xf32> to vector<1x256xf32>
    %14 = tpu.iota {dimensions = array<i32: 0>} : vector<4x256xi32>
    %15 = vector.broadcast %6 : vector<1x256xi32> to vector<4x256xi32>
    %16 = arith.cmpi eq, %14, %15 : vector<4x256xi32>
    %cst_7 = arith.constant 0.000000e+00 : f32
    %17 = vector.broadcast %cst_7 : f32 to vector<4x256xf32>
    %18 = arith.select %16, %10, %17 : vector<4x256xi1>, vector<4x256xf32>
    %cst_8 = arith.constant dense<0.000000e+00> : vector<256xf32>
    %19 = vector.multi_reduction <add>, %18, %cst_8 [0] : vector<4x256xf32> to vector<256xf32>
    %20 = vector.shape_cast %19 : vector<256xf32> to vector<1x256xf32>
    %21 = math.log %13 : vector<1x256xf32>
    %22 = arith.subf %20, %21 : vector<1x256xf32>
    %23 = math.exp %22 : vector<1x256xf32>
    %cst_9 = arith.constant 1.000000e+00 : f32
    %24 = vector.broadcast %cst_9 : f32 to vector<1x256xf32>
    %25 = arith.subf %24, %23 : vector<1x256xf32>
    %26 = arith.mulf %25, %25 : vector<1x256xf32>
    %27 = arith.mulf %26, %22 : vector<1x256xf32>
    %cst_10 = arith.constant 0.000000e+00 : f32
    %28 = vector.broadcast %cst_10 : f32 to vector<1x256xf32>
    %29 = arith.subf %28, %27 : vector<1x256xf32>
    %c0_11 = arith.constant 0 : index
    %c0_12 = arith.constant 0 : index
    %c0_13 = arith.constant 0 : index
    %30 = vector.load %arg5[%c0_11, %c0_12, %c0_13] : memref<1x1x256xf32, #tpu.memory_space<vmem>>, vector<1x1x256xf32>
    %31 = vector.shape_cast %29 : vector<1x256xf32> to vector<1x1x256xf32>
    %32 = arith.addf %30, %31 : vector<1x1x256xf32>
    %c0_14 = arith.constant 0 : index
    %c0_15 = arith.constant 0 : index
    %c0_16 = arith.constant 0 : index
    %33 = vector.load %arg5[%c0_14, %c0_15, %c0_16] : memref<1x1x256xf32, #tpu.memory_space<vmem>>, vector<1x1x256xf32>
    tpu.vector_store %arg5[%c0_14, %c0_15, %c0_16], %32 {strides = array<i32>} : memref<1x1x256xf32, #tpu.memory_space<vmem>>, vector<1x1x256xf32>,
    return
  }
  func.func @transform_0(%arg0: i32, %arg1: i32, %arg2: i32) -> (i32, i32, i32) {
    %c1_i32 = arith.constant 1 : i32
    %0 = arith.muli %arg1, %c1_i32 : i32
    %1 = arith.addi %0, %arg2 : i32
    %c0_i32 = arith.constant 0 : i32
    %c0_i32_0 = arith.constant 0 : i32
    return %arg0, %c0_i32, %1 : i32, i32, i32
  }
  func.func @transform_1(%arg0: i32, %arg1: i32, %arg2: i32) -> (i32, i32, i32) {
    %c1_i32 = arith.constant 1 : i32
    %0 = arith.muli %arg1, %c1_i32 : i32
    %1 = arith.addi %0, %arg2 : i32
    %c0_i32 = arith.constant 0 : i32
    %c0_i32_0 = arith.constant 0 : i32
    return %arg0, %c0_i32, %1 : i32, i32, i32
  }
  func.func @transform_2(%arg0: i32, %arg1: i32, %arg2: i32) -> (i32, i32, i32) {
    %c0_i32 = arith.constant 0 : i32
    %c0_i32_0 = arith.constant 0 : i32
    return %arg0, %arg1, %c0_i32 : i32, i32, i32
  }
}

</mosaic_0001>

<bundles_post_ra>
// kernel: tpu_custom_call.1
= control target key start
LH: loop header
LB: loop body
LE: loop exit
PB: predicated region body
PF: predicated region fallthrough
CT: control target
= control target key end

     0   :  { %7 = vsyncpa [#allocation3], 0  ;;  %s1008_s0 = inlined_call_operand.hbm [shape: f32[2,4,256], index: 0, kind: input, shape index: {}]   ;;  %s1009_s1 = inlined_call_operand.hbm [shape: s32[2,1,256], index: 1, kind: input, shape index: {}]   ;;  %s1010_s2 = inlined_call_operand.hbm [shape: f32[2,1,256], index: 2, kind: output, shape index: {}]  }
   0x1   :  { %9 = vsyncpa [#allocation3 + $0x1], 0 }
   0x2   :  { %10 = vsyncpa [#allocation6], 0 }
   0x3   :  { %12 = vsyncpa [#allocation6 + $0x1], 0 }
   0x4   :  { %13 = vsyncpa [#allocation4], 0 }
   0x5   :  { %15 = vsyncpa [#allocation4 + $0x1], 0  ;;  %s766_s9 = smov 0   ;;  %s768_s10 = smov 0  }
   0x6   :  { %s770_s11 = smov 0   ;;  %s772_s12 = smov 0  }
   0x7   :  { %s774_s13 = smov 0   ;;  %s776_s14 = smov 0  }
   0x8 LB: > { %s496_s15 = sadd.s32 4294967295, %s744_s14   ;;  %s497_s16 = sadd.s32 4294967294, %s744_s14   ;;  %s744_s14 = sphi %s776_s14, %s21_s14   ;;  %s740_s13 = sphi %s774_s13, %s1032_s13   ;;  %s736_s12 = sphi %s772_s12, %s1031_s12   ;;  %s732_s11 = sphi %s770_s11, %s1030_s11   ;;  %s728_s10 = sphi %s768_s10, %s1029_s10   ;;  %s724_s9 = sphi %s766_s9, %s1028_s9  }
   0x9   : > { %s40_s17 = sadd.s32 1, %s740_s13  ;;  %s51_s18 = sadd.s32 1, %s732_s11 }
   0xa   : > { %p42_p0 = scmp.ge.s32.totalorder %s40_s17, 2  ;;  %p58_p1 = scmp.ne.s32.totalorder %s732_s11, %s728_s10 }
   0xb   : > { %p59_p2 = scmp.eq.s32.totalorder %s744_s14, 0  ;;  %p64_p3 = scmp.ne.s32.totalorder %s728_s10, %s724_s9 }
   0xc   : > { %s1034_s17 = smov (%p42_p0, %s40_s17), 0  ;;  %p65_p5 = scmp.eq.s32.totalorder %s496_s15, 0 }
   0xd   : > { %p807_p4 = por %p59_p2, %p58_p1  ;;  %s46_s20 = ssub.s32 %s740_s13, %s1034_s17 }
   0xe   : > { %p120_p6 = scmp.eq.s32.totalorder %s496_s15, 1  ;;  %p49_p7 = scmp.eq.s32.totalorder %s46_s20, 0 }
   0xf   : > { %p813_p8 = por %p65_p5, %p64_p3  ;;  %p126_p10 = scmp.eq.s32.totalorder %s497_s16, 1 }
  0x10   : > { %p817_p9 = por %p120_p6, %p58_p1  ;;  %p535_p13 = scmp.lt.s32.totalorder %s744_s14, 2 }
  0x11   : > { %s1014_s21 = scalar_select %p813_p8, 1, 0 }
  0x12   : > { %s1015_s22 = scalar_select %p817_p9, 1, 0 }
  0x13   : > { %s822_s23 = scalar_select %p49_p7, %s732_s11, %s51_s18  }
  0x14   : > { %p824_p11 = por %p126_p10, %p64_p3  ;;  %s831_s25 = sand.u32 1, %s732_s11  }
  0x15   : > { %s500_s26 = sshll.u32 %s831_s25, 3  ;;  %s515_s27 = sshll.u32 %s740_s13, 7 }
  0x16   : > { %s1016_s24 = scalar_select %p824_p11, 1, 0 }
  0x17   : > { %s838_s30 = scalar_lea.hbm %s1008_s0, %s515_s27  ;;  %s150_s3 = scalar_lea.vmem [#allocation2], %s500_s26 }
  0x18   : > { %s161_s4 = sshll.u32 %s150_s3, 4  ;;  %p844_p0 = pnand %p535_p13, %p807_p4  ;;  %s840_s4 = int_to_ptr.vmem [resolvable:$true] %s161_s4 }
  0x19   : > { %s147_s6 = scalar_lea.sflag [#allocation3], %s831_s25  ;;  %s598_s7 = scalar_lea.hbm %s838_s30, 128 }
  0x1a   : > { %p599_p3 = scmp.ne.s32.totalorder %s838_s30, %s598_s7  ;;  %p600_p5 = pneg %p844_p0 }
  0x1b   : > { %s603_s16 = scalar_lea.hbm %s1008_s0, 256  ;;  %p604_p4 = scmp.lt.u32.totalorder %s838_s30, %s1008_s0 }
  0x1c   : > { %p601_p6 = pnand %p600_p5, %p599_p3  ;;  %p605_p10 = scmp.lt.u32.totalorder %s603_s16, %s598_s7 }
  0x1d   : > { %p607_p12 = scmp.lt.u32.totalorder %s598_s7, %s838_s30 }
  0x1e   : > { %p602_p7 = pneg %p601_p6  ;;  %p606_p13 = por %p605_p10, %p604_p4 }
  0x20   : > { %p608_p1 = por %p607_p12, %p606_p13 }
  0x22   : > { %p609_p2 = pnand %p608_p1, %p602_p7 }
  0x24   : > { %612 = shalt.err (!%p609_p2)
}
  0x25   : > { %s613_s20 = scalar_lea.vmem %s840_s4, 128  ;;  %s746_s26 = smov [#allocation2]  }
  0x26   : > { %p614_p3 = scmp.ne.s32.totalorder %s840_s4, %s613_s20  ;;  %s618_s27 = sshll.u32 %s746_s26, 4  ;;  %s619_s27 = int_to_ptr.vmem [resolvable:$false] %s618_s27 }
  0x27   : > { %s620_s28 = scalar_lea.vmem %s619_s27, 256  ;;  %p621_p9 = scmp.lt.s32.totalorder %s840_s4, %s619_s27 }
  0x28   : > { %p616_p6 = pnand %p614_p3, %p600_p5  ;;  %p622_p4 = scmp.lt.s32.totalorder %s620_s28, %s613_s20 }
  0x2a   : > { %p617_p11 = pneg %p616_p6  ;;  %p623_p10 = por %p622_p4, %p621_p9 }
  0x2c   : > { %p624_p12 = pnand %p623_p10, %p617_p11 }
  0x2e   : > { %627 = shalt.err (!%p624_p12)
}
  0x2f   : > { %527 = dma.hbm_to_vmem [thread:$0]  (!%p844_p0), %s838_s30, 128, %s840_s4, %s147_s6  }
  0x30   : > { %p1018_p1 = scmp.lt.s32.totalorder %s744_s14, 3  ;;  %p1019_p2 = scmp.ge.s32.totalorder %s744_s14, 1 }
  0x31   : > { %s503_s3 = sshll.u32 %s831_s25, 1  ;;  %s516_s7 = sshll.u32 %s740_s13, 5 }
  0x32   : > { %p880_p7 = pnand %p1019_p2, %p1018_p1  ;;  %s889_s16 = scalar_lea.hbm %s1009_s1, %s516_s7 }
  0x33   : > { %s172_s18 = scalar_lea.vmem [#allocation5], %s503_s3  ;;  %s169_s30 = scalar_lea.sflag [#allocation6], %s831_s25 }
  0x34   : > { %s1020_s29 = scalar_select %p880_p7, 1, 0 }
  0x35   : > { %s183_s19 = sshll.u32 %s172_s18, 4  ;;  %s628_s4 = scalar_lea.hbm %s889_s16, 32  ;;  %s184_s19 = int_to_ptr.vmem [resolvable:$true] %s183_s19 }
  0x36   : > { %p629_p9 = scmp.ne.s32.totalorder %s889_s16, %s628_s4  ;;  %s633_s26 = scalar_lea.hbm %s1009_s1, 64 }
  0x37   : > { %p634_p3 = scmp.lt.u32.totalorder %s889_s16, %s1009_s1  ;;  %p635_p6 = scmp.lt.u32.totalorder %s633_s26, %s628_s4 }
  0x38   : > { %p631_p11 = pnand %p629_p9, %p600_p5  ;;  %p637_p10 = scmp.lt.u32.totalorder %s628_s4, %s889_s16 }
  0x39   : > { %p636_p4 = por %p635_p6, %p634_p3 }
  0x3a   : > { %p632_p13 = pneg %p631_p11 }
  0x3b   : > { %p638_p12 = por %p637_p10, %p636_p4 }
  0x3d   : > { %p639_p1 = pnand %p638_p12, %p632_p13 }
  0x3f   : > { %642 = shalt.err (!%p639_p1)
}
  0x40   : > { %s643_s25 = scalar_lea.vmem %s184_s19, 32  ;;  %s747_s3 = smov [#allocation5]  }
  0x41   : > { %p644_p2 = scmp.ne.s32.totalorder %s184_s19, %s643_s25  ;;  %s648_s7 = sshll.u32 %s747_s3, 4  ;;  %s649_s7 = int_to_ptr.vmem [resolvable:$false] %s648_s7 }
  0x42   : > { %s650_s8 = scalar_lea.vmem %s649_s7, 64  ;;  %p651_p8 = scmp.lt.s32.totalorder %s184_s19, %s649_s7 }
  0x43   : > { %p646_p9 = pnand %p644_p2, %p600_p5  ;;  %p652_p7 = scmp.lt.s32.totalorder %s650_s8, %s643_s25 }
  0x45   : > { %p647_p11 = pneg %p646_p9  ;;  %p653_p3 = por %p652_p7, %p651_p8 }
  0x47   : > { %p654_p6 = pnand %p653_p3, %p647_p11 }
  0x49   : > { %657 = shalt.err (!%p654_p6)
}
  0x4a   : > { %530 = dma.hbm_to_vmem [thread:$0]  (!%p844_p0), %s889_s16, 32, %s184_s19, %s169_s30  }
  0x4b   : > { %p1021_p13 = scmp.ne.s32.totalorder %s1020_s29, 0 }
  0x4c   : > { %s914_s15 = sand.u32 (!%p1021_p13), 1, %s728_s10   ;;  %p1022_p5 = scmp.ne.s32.totalorder (!%p1021_p13), %s1014_s21, 0 }
  0x4d   : > { %192 = sbr.rel (%p1021_p13) target bundleno = 194 (0xc2), region = 28  ;;  %s507_s18 = sshll.u32 (!%p1021_p13), %s914_s15, 3 }
  0x4e   : > { %s195_s4 = scalar_lea.sflag (!%p1021_p13), [#allocation3], %s914_s15  ;;  %s198_s6 = scalar_lea.vmem (!%p1021_p13), [#allocation2], %s507_s18 }
  0x54   : > { %711 = dma.done.wait (%p1022_p5), %s195_s4, 128  }
  0x55   : > { %713 = vsyncadd (%p1022_p5), %s195_s4, 4294967168  ;;  %s508_s5 = sshll.u32 %s914_s15, 1  ;;  %s204_s29 = scalar_lea.sflag [#allocation6], %s914_s15 }
  0x56   : > { %s207_s16 = scalar_lea.vmem [#allocation5], %s508_s5 }
  0x57   : > { %715 = dma.done.wait (%p1022_p5), %s204_s29, 32  }
  0x58   : > { %717 = vsyncadd (%p1022_p5), %s204_s29, 4294967264  ;;  %v241_v0 = vlaneseq  ;;  %s932_s19 = scalar_lea.vmem [#allocation7], %s508_s5  ;;  %v748_v2 = vmov 0.0   ;;  %vm251_vm1 = vcmask 1043456   ;;  %v246_v3 = vld [vmem:[%s198_s6] sm:$0xff]  ;;  %s517_s21 = sshll.u32 %s736_s12, 5 }
  0x59   : > { %v249_v4 = vcombine.high %v246_v3, %v246_v3  ;;  %v252_v5 = vsel %vm251_vm1, %v246_v3, -inf  ;;  %v247_v23 = vld [vmem:[%s207_s16] sm:$0x3]  ;;  %s381_s30 = sshll.u32 %s932_s19, 4  ;;  %s956_s27 = scalar_lea.hbm %s1010_s2, %s517_s21  ;;  %s958_s30 = int_to_ptr.vmem [resolvable:$true] %s381_s30 }
  0x5a   : > { %vm928_vm0 = vcmp.lt.s32.totalorder %v241_v0, 256  ;;  %v253_v6 = vrot.slane %v252_v5, 4  ;;  %v939_v19 = vshrl.u32 %v241_v0, 7  ;;  %s365_s28 = scalar_lea.sflag [#allocation4], %s914_s15  ;;  %s658_s25 = scalar_lea.vmem %s958_s30, 32 }
  0x5b   : > { %245 = vst.msk [vmem:[%s932_s19] sm:$0x3] %vm928_vm0, %v748_v2  ;;  %v259_v7 = vsel %vm251_vm1, %v249_v4, -inf  ;;  %p659_p8 = scmp.ne.s32.totalorder %s958_s30, %s658_s25  ;;  %p1025_p0 = scmp.ne.s32.totalorder %s1015_s22, 0 }
  0x5c   : > { %v254_v8 = vmax.f32 %v252_v5, %v253_v6  ;;  %v260_v9 = vrot.slane %v259_v7, 4  ;;  %v294_v22 = vsub.s32 0, %v939_v19  ;;  %v298_v25 = vsub.s32 1, %v939_v19  ;;  %s750_s12 = smov [#allocation7]  }
  0x5d   : > { %p660_p7 = pnand %p659_p8, %p1025_p0  ;;  %s662_s3 = sshll.u32 %s750_s12, 4  ;;  %s663_s3 = int_to_ptr.vmem [resolvable:$false] %s662_s3 }
  0x5e   : > { %v255_v10 = vrot.slane %v254_v8, 2  ;;  %v261_v11 = vmax.f32 %v259_v7, %v260_v9  ;;  %v295_v26 = vrot.slane %v247_v23, %v294_v22  ;;  %v299_v27 = vrot.slane %v247_v23, %v298_v25  ;;  %s664_s7 = scalar_lea.vmem %s663_s3, 64  ;;  %p665_p10 = scmp.lt.s32.totalorder %s958_s30, %s663_s3 }
  0x5f   : > { %p661_p4 = pneg %p660_p7  ;;  %p666_p12 = scmp.lt.s32.totalorder %s664_s7, %s658_s25 }
  0x60   : > { %v256_v12 = vmax.f32 %v254_v8, %v255_v10  ;;  %v262_v13 = vrot.slane %v261_v11, 2  ;;  %vm300_vm2 = vcmp.eq.s32.totalorder %v939_v19, %v295_v26  ;;  %vm301_vm3 = vcmp.eq.s32.totalorder %v939_v19, %v299_v27 }
  0x61   : > { %v749_v8 = vmov 1966171168   ;;  %p667_p1 = por %p666_p12, %p665_p10 }
  0x62   : > { %v257_v14 = vrot.slane %v256_v12, 1  ;;  %v263_v15 = vmax.f32 %v261_v11, %v262_v13  ;;  %v344_v9 = vunpack.c.l.s4 %v749_v8  ;;  %v339_v23 = vld [vmem:[%s932_s19] sm:$0x3] }
  0x63   : > { %p668_p2 = pnand %p667_p1, %p661_p4 }
  0x64   : > { %v258_v16 = vmax.f32 %v256_v12, %v257_v14  ;;  %v264_v17 = vrot.slane %v263_v15, 1 }
  0x66   : > { %v265_v18 = vmax.f32 %v263_v15, %v264_v17  ;;  %v345_v15 = vunpack.c.0.s8 %v344_v9 }
  0x68   : > { %v268_v20 = vcombine.low %v258_v16, %v265_v18 }
  0x6a   : > { %v270_v21 = vsub.f32 %v246_v3, %v268_v20  ;;  %v348_v20 = vsub.s32 %v345_v15, %v939_v19 }
  0x6c   : > { %v271_v24 = vmul.f32 1.442695, %v270_v21  ;;  %v303_v28 = vcombine.high %v270_v21, %v270_v21  ;;  %v305_v29 = vsel %vm300_vm2, %v270_v21, 0.0 }
  0x6d   : > { %v307_v32 = vsel %vm251_vm1, %v305_v29, 0.0 }
  0x6e   : > { %588 = vpow2.f32 %v271_v24  ;;  %v306_v30 = vsel %vm301_vm3, %v303_v28, 0.0  ;;  %v308_v38 = vrot.slane %v307_v32, 4 }
  0x6f   : > { %v314_v36 = vsel %vm251_vm1, %v306_v30, 0.0 }
  0x70   : > { %v315_v41 = vrot.slane %v314_v36, 4  ;;  %v309_v44 = vadd.f32 %v308_v38, %v307_v32 }
  0x72   : > { %v316_v47 = vadd.f32 %v315_v41, %v314_v36  ;;  %v310_v50 = vrot.slane %v309_v44, 2 }
  0x74   : > { %v317_v53 = vrot.slane %v316_v47, 2  ;;  %v311_v55 = vadd.f32 %v310_v50, %v309_v44 }
  0x76   : > { %v318_v56 = vadd.f32 %v317_v53, %v316_v47  ;;  %v312_v57 = vrot.slane %v311_v55, 1 }
  0x78   : > { %v589_v31 = vpop.eup %588  ;;  %v319_v58 = vrot.slane %v318_v56, 1  ;;  %v313_v59 = vadd.f32 %v312_v57, %v311_v55 }
  0x79   : > { %v274_v33 = vcombine.high %v589_v31, %v589_v31  ;;  %v276_v34 = vsel %vm251_vm1, %v589_v31, 0.0 }
  0x7a   : > { %v277_v35 = vrot.slane %v276_v34, 4  ;;  %v320_v61 = vadd.f32 %v319_v58, %v318_v56 }
  0x7b   : > { %v283_v37 = vsel %vm251_vm1, %v274_v33, 0.0 }
  0x7c   : > { %v278_v39 = vadd.f32 %v277_v35, %v276_v34  ;;  %v284_v40 = vrot.slane %v283_v37, 4 }
  0x7e   : > { %v279_v42 = vrot.slane %v278_v39, 2  ;;  %v285_v43 = vadd.f32 %v284_v40, %v283_v37 }
  0x80   : > { %v280_v45 = vadd.f32 %v279_v42, %v278_v39  ;;  %v286_v46 = vrot.slane %v285_v43, 2 }
  0x82   : > { %v281_v48 = vrot.slane %v280_v45, 1  ;;  %v287_v49 = vadd.f32 %v286_v46, %v285_v43 }
  0x84   : > { %v282_v51 = vadd.f32 %v281_v48, %v280_v45  ;;  %v288_v52 = vrot.slane %v287_v49, 1 }
  0x86   : > { %v289_v54 = vadd.f32 %v288_v52, %v287_v49  ;;  %590 = vlog2.f32 %v282_v51 }
  0x88   : > { %592 = vlog2.f32 %v289_v54 }
  0x90   : > { %v591_v60 = vpop.eup %590 }
  0x91   : > { %v322_v62 = vmul.f32 0.6931472, %v591_v60 }
  0x92   : > { %v593_v63 = vpop.eup %592 }
  0x93   : > { %v324_v0 = vmul.f32 0.6931472, %v593_v63  ;;  %v325_v2 = vsub.f32 %v313_v59, %v322_v62 }
  0x95   : > { %v326_v3 = vsub.f32 %v320_v61, %v324_v0  ;;  %v327_v4 = vmul.f32 1.442695, %v325_v2 }
  0x97   : > { %594 = vpow2.f32 %v327_v4  ;;  %v329_v5 = vmul.f32 1.442695, %v326_v3 }
  0x99   : > { %596 = vpow2.f32 %v329_v5 }
  0xa1   : > { %v595_v6 = vpop.eup %594 }
  0xa2   : > { %v331_v7 = vsub.f32 1.0, %v595_v6 }
  0xa3   : > { %v597_v10 = vpop.eup %596 }
  0xa4   : > { %v332_v11 = vsub.f32 1.0, %v597_v10  ;;  %v333_v12 = vmul.f32 %v331_v7, %v331_v7 }
  0xa6   : > { %v334_v13 = vmul.f32 %v332_v11, %v332_v11  ;;  %v335_v14 = vmul.f32 %v333_v12, %v325_v2 }
  0xa8   : > { %v336_v16 = vmul.f32 %v334_v13, %v326_v3  ;;  %v337_v17 = vsub.f32 0.0, %v335_v14 }
  0xaa   : > { %v338_v18 = vsub.f32 0.0, %v336_v16 }
  0xac   : > { %v342_v21 = vcombine.low %v337_v17, %v338_v18 }
  0xae   : > { %v349_v22 = vrot.slane %v342_v21, %v348_v20 }
  0xb0   : > { %v356_v24 = vrot.slane %v349_v22, %v348_v20 }
  0xb2   : > { %v358_v25 = vadd.f32 %v356_v24, %v339_v23 }
  0xb4   : > { %363 = vst.msk [vmem:[%s932_s19] sm:$0x3] %vm928_vm0, %v358_v25 }
  0xb5   : > { %671 = shalt.err (!%p668_p2)
}
  0xb6   : > { %s672_s8 = scalar_lea.hbm %s956_s27, 32  ;;  %s676_s4 = scalar_lea.hbm %s1010_s2, 64 }
  0xb7   : > { %p673_p9 = scmp.ne.s32.totalorder %s956_s27, %s672_s8  ;;  %p677_p6 = scmp.lt.u32.totalorder %s956_s27, %s1010_s2 }
  0xb8   : > { %p678_p13 = scmp.lt.u32.totalorder %s676_s4, %s672_s8  ;;  %p680_p8 = scmp.lt.u32.totalorder %s672_s8, %s956_s27 }
  0xb9   : > { %p674_p11 = pnand %p673_p9, %p1025_p0 }
  0xba   : > { %p679_p5 = por %p678_p13, %p677_p6 }
  0xbb   : > { %p675_p3 = pneg %p674_p11 }
  0xbc   : > { %p681_p7 = por %p680_p8, %p679_p5 }
  0xbe   : > { %p682_p4 = pnand %p681_p7, %p675_p3 }
  0xc0   : > { %685 = shalt.err (!%p682_p4)
}
  0xc1   : > { %522 = dma.vmem_to_hbm [thread:$0]  (%p1025_p0), %s958_s30, 32, %s956_s27, %s365_s28  }
  0xc2 PF: > { %s393_s29 = sand.u32 1, %s724_s9   ;;  %p1026_p10 = scmp.ne.s32.totalorder %s1016_s24, 0 }
  0xc3   : > { %p1027_p12 = scmp.ge.s32.totalorder %s744_s14, 2  ;;  %s394_s16 = scalar_lea.sflag [#allocation4], %s393_s29 }
  0xc5   : > { %p532_p1 = pnand %p1027_p12, %p1026_p10 }
  0xc7   : > { %719 = dma.done.wait (!%p532_p1), %s394_s16, 32  }
  0xc8   : > { %721 = vsyncadd (!%p532_p1), %s394_s16, 4294967264  ;;  %s21_s14 = sadd.s32 1, %s744_s14   ;;  %s1028_s9 = smov %s728_s10 }
  0xc9   : > { %p18_p2 = scmp.ge.s32.totalorder %s21_s14, 4   ;;  %s1029_s10 = smov %s732_s11 }
  0xca   : > { %s1030_s11 = smov %s822_s23  ;;  %s1031_s12 = smov %s740_s13 }
  0xcb   : > { %s1032_s13 = smov %s1034_s17  ;;  %20 = sbr.rel (!%p18_p2) target bundleno = 8 (0x8), region = 90 }
  0xd2   :  { %399 = vsyncpa [#allocation3], 1 }
  0xd3   :  { %401 = vsyncpa [#allocation3 + $0x1], 1 }
  0xd4   :  { %402 = vsyncpa [#allocation6], 1 }
  0xd5   :  { %404 = vsyncpa [#allocation6 + $0x1], 1 }
  0xd6   :  { %405 = vsyncpa [#allocation4], 1 }
  0xd7   :  { %407 = vsyncpa [#allocation4 + $0x1], 1 }

</bundles_post_ra>
